<compile_context>
chip_gen: v6e
topology: v6e:2x2x1
jax: 0.10.0
libtpu: 0.0.40
codegen_flags: <defaults>
</compile_context>

<pallas_src>
import math

import jax
import jax.numpy as jnp
from jax.experimental import pallas as pl
from jax.experimental.pallas import tpu as pltpu


def _constant_input_kernel(const_ref, out_ref):
    # const_ref: (1, tile_f) VMEM tile of the (possibly lane-repacked) constant
    # out_ref:   (tile_b, tile_f) VMEM tile of the output block
    out_ref[...] = jnp.broadcast_to(const_ref[...], out_ref.shape)


def _choose_tiles(b_eff, f_eff, itemsize, sublane_mult, target_bytes):
    """Pick (tile_b, tile_f) so each output block is ~target_bytes.

    tile_b is a multiple of the dtype's sublane packing (or the full batch);
    tile_f is a multiple of 128 lanes (or the full feature width).
    """
    row_bytes = f_eff * itemsize
    if sublane_mult * row_bytes <= target_bytes:
        # Full-width rows: tile over the batch axis only.
        tile_f = f_eff
        rows = (target_bytes // row_bytes) // sublane_mult * sublane_mult
        rows = max(sublane_mult, rows)
        tile_b = b_eff if rows >= b_eff else rows
    else:
        # Even a minimal row group exceeds the target: tile the feature dim too
        # (keeps double-buffered blocks under scoped VMEM for huge C*H*W).
        tile_b = b_eff if b_eff <= sublane_mult else sublane_mult
        lanes = (target_bytes // (tile_b * itemsize)) // 128 * 128
        lanes = max(128, lanes)
        tile_f = f_eff if lanes >= f_eff else lanes
    return tile_b, tile_f


def constant_input_forward(x, const, *, tile_b=None, tile_f=None,
                           target_bytes=8 * 1024 * 1024):
    """Replicates `const` (1, C, H, W) across the batch dim of `x`.

    Only x.shape[0] is consumed (matching the PyTorch forward).
    Returns an array of shape (batch, C, H, W) with const's dtype.
    """
    batch = x.shape[0]
    _, c, h, w = const.shape
    feat = c * h * w
    itemsize = jnp.dtype(const.dtype).itemsize
    sublane_mult = max(8, 32 // itemsize)  # 8 f32, 16 bf16, 32 int8/fp8

    # ---- lane-dense repack: fold r batch copies into one 128-multiple row ----
    r = 128 // math.gcd(feat, 128)
    if r > 1 and batch % r == 0:
        b_eff, f_eff = batch // r, feat * r
        const_flat = jnp.tile(const.reshape(1, feat), (1, r))
    else:
        r = 1
        b_eff, f_eff = batch, feat
        const_flat = const.reshape(1, feat)

    # ---- tile selection ----
    auto_b, auto_f = _choose_tiles(b_eff, f_eff, itemsize, sublane_mult,
                                   target_bytes)
    explicit_b = tile_b is not None
    if tile_b is None:
        tile_b = auto_b
    if tile_f is None:
        tile_f = auto_f

    # Ensure >= 2 batch blocks for large outputs so megacore (v7x) can shard.
    total_bytes = b_eff * f_eff * itemsize
    if (not explicit_b and total_bytes >= (2 << 20)
            and b_eff >= 2 * sublane_mult and tile_b >= b_eff):
        tile_b = max(sublane_mult, (b_eff // 2) // sublane_mult * sublane_mult)

    grid = (pl.cdiv(b_eff, tile_b), pl.cdiv(f_eff, tile_f))

    # Scoped-VMEM budget: double-buffered output + constant blocks, with margin
    # (v5e's 16 MiB default would otherwise reject 8 MiB blocks).
    out_block_bytes = tile_b * tile_f * itemsize
    const_block_bytes = tile_f * itemsize
    needed = 2 * out_block_bytes + 2 * const_block_bytes
    vmem_limit = int(min(max(2 * needed, 32 << 20), 48 << 20))

    out_flat = pl.pallas_call(
        _constant_input_kernel,
        out_shape=jax.ShapeDtypeStruct((b_eff, f_eff), const.dtype),
        grid_spec=pl.GridSpec(
            grid=grid,
            in_specs=[
                # Constant: same batch block for every step; feature block
                # follows the output's feature block.
                pl.BlockSpec((1, tile_f), lambda b, f: (0, f)),
            ],
            out_specs=pl.BlockSpec((tile_b, tile_f), lambda b, f: (b, f)),
        ),
        compiler_params=pltpu.CompilerParams(
            dimension_semantics=("parallel", "parallel"),
            vmem_limit_bytes=vmem_limit,
        ),
    )(const_flat)

    # Row-major (b_eff, r*feat) holds the batch copies in order -> plain reshape.
    return out_flat.reshape(batch, c, h, w)


if __name__ == "__main__":
    key = jax.random.PRNGKey(0)
    k_const, k_x = jax.random.split(key)

    # --- main config (module default): channel=4, size=4 -> param (1,4,4,4) ---
    channel, size = 4, 4
    const_param = jax.random.normal(
        k_const, (1, channel, size, size), dtype=jnp.float32
    )

    # The forward only reads input.shape[0]; use a small latent-like input.
    batch = 2
    x = jax.random.normal(k_x, (batch, 32), dtype=jnp.float32)

    out = jax.block_until_ready(constant_input_forward(x, const_param))
    ref = jnp.broadcast_to(const_param, (batch, channel, size, size))
    assert out.shape == (batch, channel, size, size), out.shape
    assert out.dtype == const_param.dtype
    assert bool(jnp.allclose(out, ref)), "mismatch vs reference (repacked path)"

    # --- fallback path: batch not divisible by the repack factor r=2 ---
    batch_f = 3
    x_f = jnp.zeros((batch_f, 32), dtype=jnp.float32)
    out_f = jax.block_until_ready(constant_input_forward(x_f, const_param))
    ref_f = jnp.broadcast_to(const_param, (batch_f, channel, size, size))
    assert bool(jnp.allclose(out_f, ref_f)), "mismatch on fallback path"

    # --- 2-D grid path: multi-block batch (ragged edge) + tiled feature dim ---
    channel2, size2 = 8, 16            # feat = 2048 (already 128-multiple)
    const2 = jax.random.normal(
        jax.random.PRNGKey(1), (1, channel2, size2, size2), dtype=jnp.float32
    )
    batch2 = 20
    x2 = jnp.zeros((batch2, 32), dtype=jnp.float32)
    out2 = jax.block_until_ready(
        constant_input_forward(x2, const2, tile_b=8, tile_f=256)
    )
    ref2 = jnp.broadcast_to(const2, (batch2, channel2, size2, size2))
    assert out2.shape == (batch2, channel2, size2, size2), out2.shape
    assert bool(jnp.allclose(out2, ref2)), "mismatch on 2-D tiled path"

    # --- bf16 path: dtype-aware sublane rounding (16) ---
    const_bf = jax.random.normal(
        jax.random.PRNGKey(2), (1, 4, 8, 8), dtype=jnp.float32
    ).astype(jnp.bfloat16)
    x_bf = jnp.zeros((4, 32), dtype=jnp.float32)
    out_bf = jax.block_until_ready(constant_input_forward(x_bf, const_bf))
    ref_bf = jnp.broadcast_to(const_bf, (4, 4, 8, 8))
    assert out_bf.dtype == jnp.bfloat16
    assert bool(jnp.all(out_bf == ref_bf)), "mismatch on bf16 path"

    print("KERNEL_OK")
</pallas_src>

<mosaic_0001>
module attributes {stable_mosaic.version = 11 : i64} {
  func.func @_constant_input_kernel(%arg0: i32, %arg1: i32, %arg2: memref<1x128xf32, #tpu.memory_space<vmem>>, %arg3: memref<1x128xf32, #tpu.memory_space<vmem>>) attributes {dimension_semantics = [#tpu.dimension_semantics<parallel>, #tpu.dimension_semantics<parallel>], iteration_bounds = array<i64: 1, 1>, scalar_prefetch = 0 : i64, scratch_operands = 0 : i64, tpu.core_type = #tpu.core_type<tc>, window_params = [{transform_indices = @transform_0, window_bounds = array<i64: 1, 128>}, {transform_indices = @transform_1, window_bounds = array<i64: 1, 128>}]} {
    %c0 = arith.constant 0 : index
    %c0_0 = arith.constant 0 : index
    %0 = vector.load %arg2[%c0, %c0_0] : memref<1x128xf32, #tpu.memory_space<vmem>>, vector<1x128xf32>
    %c0_1 = arith.constant 0 : index
    %c0_2 = arith.constant 0 : index
    %1 = vector.load %arg3[%c0_1, %c0_2] : memref<1x128xf32, #tpu.memory_space<vmem>>, vector<1x128xf32>
    tpu.vector_store %arg3[%c0_1, %c0_2], %0 {strides = array<i32>} : memref<1x128xf32, #tpu.memory_space<vmem>>, vector<1x128xf32>,
    return
  }
  func.func @transform_0(%arg0: i32, %arg1: i32) -> (i32, i32) {
    %c0_i32 = arith.constant 0 : i32
    %c0_i32_0 = arith.constant 0 : i32
    return %c0_i32, %arg1 : i32, i32
  }
  func.func @transform_1(%arg0: i32, %arg1: i32) -> (i32, i32) {
    %c0_i32 = arith.constant 0 : i32
    return %arg0, %arg1 : i32, i32
  }
}

</mosaic_0001>

<bundles_post_ra>
// kernel: tpu_custom_call.1
= control target key start
LH: loop header
LB: loop body
LE: loop exit
PB: predicated region body
PF: predicated region fallthrough
CT: control target
= control target key end

     0   :  { %6 = vsyncpa [#allocation3], 0  ;;  %s102_s0 = inlined_call_operand.hbm [shape: f32[1,128], index: 0, kind: input, shape index: {}]   ;;  %s103_s1 = inlined_call_operand.hbm [shape: f32[1,128], index: 1, kind: output, shape index: {}]  }
   0x1   :  { %7 = vsyncpa [#allocation4], 0  ;;  %s84_s6 = smov [#allocation2]  }
   0x2   :  { %s14_s7 = sshll.u32 %s84_s6, 4  ;;  %s15_s7 = int_to_ptr.vmem [resolvable:$true] %s14_s7 }
   0x3   :  { %s48_s8 = scalar_lea.vmem %s15_s7, 16  ;;  %s52_s9 = scalar_lea.vmem %s15_s7, 32 }
   0x4   :  { %p49_p0 = scmp.ne.s32.totalorder %s15_s7, %s48_s8  ;;  %p53_p1 = scmp.lt.s32.totalorder %s15_s7, %s15_s7 }
   0x5   :  { %p54_p2 = scmp.lt.s32.totalorder %s52_s9, %s48_s8 }
   0x7   :  { %p55_p3 = por %p54_p2, %p53_p1 }
   0x9   :  { %p56_p4 = pnand %p55_p3, %p49_p0 }
   0xb   :  { %59 = shalt.err (!%p56_p4)
}
   0xc   :  { %17 = dma.hbm_to_vmem [thread:$0]  %s102_s0, 16, %s15_s7, [#allocation3]  }
   0xd   :  { %80 = dma.done.wait [#allocation3], 16  }
   0xe   :  { %81 = vsyncadd [#allocation3], 4294967280  ;;  %s85_s12 = smov [#allocation5]   ;;  %v21_v0 = vld [vmem:[#allocation2] sm:$0x1] }
   0xf   :  { %s29_s13 = sshll.u32 %s85_s12, 4  ;;  %22 = vst [vmem:[#allocation5] sm:$0x1] %v21_v0  ;;  %s30_s13 = int_to_ptr.vmem [resolvable:$true] %s29_s13 }
  0x10   :  { %s60_s14 = scalar_lea.vmem %s30_s13, 16  ;;  %s64_s15 = scalar_lea.vmem %s30_s13, 32 }
  0x11   :  { %p61_p5 = scmp.ne.s32.totalorder %s30_s13, %s60_s14  ;;  %p65_p6 = scmp.lt.s32.totalorder %s30_s13, %s30_s13 }
  0x12   :  { %p66_p7 = scmp.lt.s32.totalorder %s64_s15, %s60_s14 }
  0x14   :  { %p67_p8 = por %p66_p7, %p65_p6 }
  0x16   :  { %p68_p9 = pnand %p67_p8, %p61_p5 }
  0x18   :  { %71 = shalt.err (!%p68_p9)
}
  0x19   :  { %32 = dma.vmem_to_hbm [thread:$0]  %s30_s13, 16, %s103_s1, [#allocation4]  }
  0x1a   :  { %82 = dma.done.wait [#allocation4], 16  }
  0x1b   :  { %83 = vsyncadd [#allocation4], 4294967280 }
  0x1c   :  { %36 = vsyncpa [#allocation3], 1 }
  0x1d   :  { %37 = vsyncpa [#allocation4], 1 }

</bundles_post_ra>
